<compile_context>
chip_gen: v5e
topology: v5e:2x2
jax: 0.10.0
libtpu: 0.0.40
codegen_flags: <defaults>
</compile_context>

<pallas_src>
import functools

import jax
import jax.numpy as jnp
from jax.experimental import pallas as pl
from jax.experimental.pallas import tpu as pltpu


def generator_kernel(x_ref, w1_ref, b1_ref, w2_ref, b2_ref, o_ref):
    """Fused MLP on one batch tile. MXU inputs bf16, accumulation/epilogue f32."""
    # fc1: cast x to bf16 only here (no wrapper-side pad/astype ops).
    x = x_ref[...].astype(w1_ref.dtype)
    h = jnp.dot(x, w1_ref[...], preferred_element_type=jnp.float32)
    h = h + b1_ref[...]                      # broadcast (1, hidden), f32
    h = jnp.maximum(h, 0.2 * h)              # LeakyReLU(0.2): mul+max only
    # fc2: bf16 MXU input, f32 accumulate; tanh on EUP in f32.
    y = jnp.dot(h.astype(w2_ref.dtype), w2_ref[...],
                preferred_element_type=jnp.float32)
    y = y + b2_ref[...]                      # broadcast (1, out), f32
    o_ref[...] = jnp.tanh(y).astype(o_ref.dtype)


def _round_up(n, m):
    return -(-n // m) * m


def _num_tensorcores():
    """2 TensorCores per chip only on v7x; v5e/v6e have one."""
    try:
        kind = jax.devices()[0].device_kind.lower()
        if "v7" in kind:
            return 2
    except Exception:
        pass
    return 1


def pick_batch_tile(batch):
    """Static batch-tile choice (Python-side, feeds jit static arg `tm`)."""
    n_tc = _num_tensorcores()
    if n_tc >= 2:
        # v7x: split the batch across both TCs, <=256 MXU rows per tile.
        tm = min(256, _round_up(_round_up(batch, 2) // 2, 8))
    else:
        # v5e/v6e: one grid step whenever the batch fits a 256-row tile.
        tm = min(256, _round_up(batch, 8))
    return max(tm, 8)


@functools.partial(jax.jit, static_argnames=("tm", "out_dtype"))
def generator_forward(x, w1, b1, w2, b2, *, tm=128, out_dtype=jnp.float32):
    B, in_dim = x.shape
    hidden = w1.shape[1]
    out_dim = w2.shape[1]

    # Pad batch only if tm does not divide it (sliced off at the end).
    b_pad = (-B) % tm
    if b_pad:
        x = jnp.pad(x, ((0, b_pad), (0, 0)))
    bp = B + b_pad

    grid = (bp // tm,)
    out = pl.pallas_call(
        generator_kernel,
        out_shape=jax.ShapeDtypeStruct((bp, out_dim), out_dtype),
        grid_spec=pltpu.PrefetchScalarGridSpec(
            num_scalar_prefetch=0,
            grid=grid,
            in_specs=[
                pl.BlockSpec((tm, in_dim), lambda i: (i, 0)),        # x tile (f32)
                pl.BlockSpec((in_dim, hidden), lambda i: (0, 0)),    # W1 bf16, VMEM resident
                pl.BlockSpec((1, hidden), lambda i: (0, 0)),         # b1 f32, resident
                pl.BlockSpec((hidden, out_dim), lambda i: (0, 0)),   # W2 bf16, resident
                pl.BlockSpec((1, out_dim), lambda i: (0, 0)),        # b2 f32, resident
            ],
            out_specs=pl.BlockSpec((tm, out_dim), lambda i: (i, 0)),
        ),
        compiler_params=pltpu.CompilerParams(
            dimension_semantics=("parallel",),   # batch tiles shard across TCs on v7x
        ),
    )(x, w1, b1, w2, b2)
    if b_pad:
        out = out[:B]
    return out


def init_params(key, input_size, hidden, output_size):
    """PyTorch nn.Linear-style init (uniform +/- 1/sqrt(fan_in)), f32, [in, out]."""
    k1, k2, k3, k4 = jax.random.split(key, 4)
    bound1 = 1.0 / (input_size ** 0.5)
    bound2 = 1.0 / (hidden ** 0.5)
    w1 = jax.random.uniform(k1, (input_size, hidden), jnp.float32, -bound1, bound1)
    b1 = jax.random.uniform(k2, (1, hidden), jnp.float32, -bound1, bound1)
    w2 = jax.random.uniform(k3, (hidden, output_size), jnp.float32, -bound2, bound2)
    b2 = jax.random.uniform(k4, (1, output_size), jnp.float32, -bound2, bound2)
    return w1, b1, w2, b2


def prepare_params(w1, b1, w2, b2):
    """One-time (offline) prep: bf16 MXU weights, f32 row-vector biases."""
    return (w1.astype(jnp.bfloat16),
            b1.astype(jnp.float32).reshape(1, -1),
            w2.astype(jnp.bfloat16),
            b2.astype(jnp.float32).reshape(1, -1))


if __name__ == "__main__":
    # Generator(input_size, output_size): x [batch, input_size] -> [batch, output_size].
    batch, input_size, hidden, output_size = 256, 64, 256, 128

    key = jax.random.PRNGKey(0)
    kx, kp = jax.random.split(key)
    x = jax.random.normal(kx, (batch, input_size), jnp.float32)
    w1, b1, w2, b2 = init_params(kp, input_size, hidden, output_size)
    p_w1, p_b1, p_w2, p_b2 = prepare_params(w1, b1, w2, b2)   # once, not per call

    tm = pick_batch_tile(batch)   # 256 (grid=(1,)) on v5e/v6e, 128 (grid=(2,)) on v7x
    out = generator_forward(x, p_w1, p_b1, p_w2, p_b2, tm=tm)
    out = jax.block_until_ready(out)

    # Pure-JAX f32 reference; tolerance covers bf16 MXU-weight quantization
    # (f32 accumulation + tanh compression keep error well under 2e-2).
    h_ref = x @ w1 + b1
    h_ref = jnp.where(h_ref > 0, h_ref, 0.2 * h_ref)
    ref = jnp.tanh(h_ref @ w2 + b2)
    assert out.shape == (batch, output_size)
    assert jnp.allclose(out, ref, atol=2e-2, rtol=0), float(jnp.max(jnp.abs(out - ref)))

    print("KERNEL_OK")
</pallas_src>

<mosaic_0001>
module attributes {stable_mosaic.version = 11 : i64} {
  func.func @generator_kernel(%arg0: i32, %arg1: memref<256x64xf32, #tpu.memory_space<vmem>>, %arg2: memref<64x256xbf16, #tpu.memory_space<vmem>>, %arg3: memref<1x256xf32, #tpu.memory_space<vmem>>, %arg4: memref<256x128xbf16, #tpu.memory_space<vmem>>, %arg5: memref<1x128xf32, #tpu.memory_space<vmem>>, %arg6: memref<256x128xf32, #tpu.memory_space<vmem>>) attributes {dimension_semantics = [#tpu.dimension_semantics<parallel>], iteration_bounds = array<i64: 1>, scalar_prefetch = 0 : i64, scratch_operands = 0 : i64, tpu.core_type = #tpu.core_type<tc>, window_params = [{transform_indices = @transform_0, window_bounds = array<i64: 256, 64>}, {pipeline_mode = #tpu.pipeline_mode<synchronous>, transform_indices = @transform_1, window_bounds = array<i64: 64, 256>}, {pipeline_mode = #tpu.pipeline_mode<synchronous>, transform_indices = @transform_2, window_bounds = array<i64: 1, 256>}, {pipeline_mode = #tpu.pipeline_mode<synchronous>, transform_indices = @transform_3, window_bounds = array<i64: 256, 128>}, {pipeline_mode = #tpu.pipeline_mode<synchronous>, transform_indices = @transform_4, window_bounds = array<i64: 1, 128>}, {transform_indices = @transform_5, window_bounds = array<i64: 256, 128>}]} {
    %c0 = arith.constant 0 : index
    %c0_0 = arith.constant 0 : index
    %0 = vector.load %arg1[%c0, %c0_0] : memref<256x64xf32, #tpu.memory_space<vmem>>, vector<256x64xf32>
    %1 = arith.truncf %0 : vector<256x64xf32> to vector<256x64xbf16>
    %c0_1 = arith.constant 0 : index
    %c0_2 = arith.constant 0 : index
    %2 = vector.load %arg2[%c0_1, %c0_2] : memref<64x256xbf16, #tpu.memory_space<vmem>>, vector<64x256xbf16>
    %cst = arith.constant dense<0.000000e+00> : vector<256x256xf32>
    %3 = tpu.matmul %1, %2, %cst {dimension_numbers = #tpu.dot_dimension_numbers<[1], [0], [0], [1], [0, 0, 1, 1], [], []>} : vector<256x64xbf16>, vector<64x256xbf16>, vector<256x256xf32> -> vector<256x256xf32>
    %c0_3 = arith.constant 0 : index
    %c0_4 = arith.constant 0 : index
    %4 = vector.load %arg3[%c0_3, %c0_4] : memref<1x256xf32, #tpu.memory_space<vmem>>, vector<1x256xf32>
    %5 = vector.broadcast %4 : vector<1x256xf32> to vector<256x256xf32>
    %6 = arith.addf %3, %5 : vector<256x256xf32>
    %cst_5 = arith.constant 2.000000e-01 : f32
    %7 = vector.broadcast %cst_5 : f32 to vector<256x256xf32>
    %8 = arith.mulf %7, %6 : vector<256x256xf32>
    %9 = arith.maximumf %6, %8 : vector<256x256xf32>
    %10 = arith.truncf %9 : vector<256x256xf32> to vector<256x256xbf16>
    %c0_6 = arith.constant 0 : index
    %c0_7 = arith.constant 0 : index
    %11 = vector.load %arg4[%c0_6, %c0_7] : memref<256x128xbf16, #tpu.memory_space<vmem>>, vector<256x128xbf16>
    %cst_8 = arith.constant dense<0.000000e+00> : vector<256x128xf32>
    %12 = tpu.matmul %10, %11, %cst_8 {dimension_numbers = #tpu.dot_dimension_numbers<[1], [0], [0], [1], [0, 0, 1, 1], [], []>} : vector<256x256xbf16>, vector<256x128xbf16>, vector<256x128xf32> -> vector<256x128xf32>
    %c0_9 = arith.constant 0 : index
    %c0_10 = arith.constant 0 : index
    %13 = vector.load %arg5[%c0_9, %c0_10] : memref<1x128xf32, #tpu.memory_space<vmem>>, vector<1x128xf32>
    %14 = vector.broadcast %13 : vector<1x128xf32> to vector<256x128xf32>
    %15 = arith.addf %12, %14 : vector<256x128xf32>
    %16 = math.tanh %15 : vector<256x128xf32>
    %c0_11 = arith.constant 0 : index
    %c0_12 = arith.constant 0 : index
    %17 = vector.load %arg6[%c0_11, %c0_12] : memref<256x128xf32, #tpu.memory_space<vmem>>, vector<256x128xf32>
    tpu.vector_store %arg6[%c0_11, %c0_12], %16 {strides = array<i32>} : memref<256x128xf32, #tpu.memory_space<vmem>>, vector<256x128xf32>,
    return
  }
  func.func @transform_0(%arg0: i32) -> (i32, i32) {
    %c0_i32 = arith.constant 0 : i32
    %c0_i32_0 = arith.constant 0 : i32
    return %arg0, %c0_i32 : i32, i32
  }
  func.func @transform_1(%arg0: i32) -> (i32, i32) {
    %c0_i32 = arith.constant 0 : i32
    %c0_i32_0 = arith.constant 0 : i32
    %c0_i32_1 = arith.constant 0 : i32
    return %c0_i32, %c0_i32_0 : i32, i32
  }
  func.func @transform_2(%arg0: i32) -> (i32, i32) {
    %c0_i32 = arith.constant 0 : i32
    %c0_i32_0 = arith.constant 0 : i32
    %c0_i32_1 = arith.constant 0 : i32
    return %c0_i32, %c0_i32_0 : i32, i32
  }
  func.func @transform_3(%arg0: i32) -> (i32, i32) {
    %c0_i32 = arith.constant 0 : i32
    %c0_i32_0 = arith.constant 0 : i32
    %c0_i32_1 = arith.constant 0 : i32
    return %c0_i32, %c0_i32_0 : i32, i32
  }
  func.func @transform_4(%arg0: i32) -> (i32, i32) {
    %c0_i32 = arith.constant 0 : i32
    %c0_i32_0 = arith.constant 0 : i32
    %c0_i32_1 = arith.constant 0 : i32
    return %c0_i32, %c0_i32_0 : i32, i32
  }
  func.func @transform_5(%arg0: i32) -> (i32, i32) {
    %c0_i32 = arith.constant 0 : i32
    %c0_i32_0 = arith.constant 0 : i32
    return %arg0, %c0_i32 : i32, i32
  }
}

</mosaic_0001>

<bundles_post_ra>
// kernel: generator_forward.1
= control target key start
LH: loop header
LB: loop body
LE: loop exit
PB: predicated region body
PF: predicated region fallthrough
CT: control target
= control target key end

     0   :  { %s1517_s0 = inlined_call_operand.vmem [shape: f32[256,64], index: 0, kind: input, shape index: {}]   ;;  %s1518_s1 = inlined_call_operand.vmem [shape: bf16[64,256], index: 1, kind: input, shape index: {}]   ;;  %s1519_s2 = inlined_call_operand.vmem [shape: f32[1,256], index: 2, kind: input, shape index: {}]   ;;  %s1520_s3 = inlined_call_operand.vmem [shape: bf16[256,128], index: 3, kind: input, shape index: {}]   ;;  %s1521_s4 = inlined_call_operand.vmem [shape: f32[1,128], index: 4, kind: input, shape index: {}]   ;;  %s1522_s5 = inlined_call_operand.hbm [shape: f32[256,128], index: 5, kind: output, shape index: {}]  }
   0x1   :  { %v929_v0 = vld [vmem:[%s1518_s1 + $0x30] sm:$0xf]  ;;  %v1038_v1 = vld [vmem:[%s1518_s1 + $0x34] sm:$0xf0]  ;;  %v1037_v2 = vld [vmem:[%s1518_s1 + $0x34] sm:$0xf] }
   0x2   :  { %v930_v3 = vor.u32 %v1038_v1, %v929_v0  ;;  %v931_v4 = vld [vmem:[%s1518_s1 + $0x38] sm:$0xf0]  ;;  %v921_v5 = vld [vmem:[%s1518_s1 + $0x20] sm:$0xf]  ;;  %v1036_v6 = vld [vmem:[%s1518_s1 + $0x24] sm:$0xf0] }
   0x3   :  { %v934_v7 = vor.u32 %v1037_v2, %v931_v4  ;;  %v1035_v8 = vld [vmem:[%s1518_s1 + $0x24] sm:$0xf]  ;;  %v923_v9 = vld [vmem:[%s1518_s1 + $0x28] sm:$0xf0]  ;;  %v922_v10 = vor.u32 %v1036_v6, %v921_v5  ;;  %v913_v12 = vld [vmem:[%s1518_s1 + $0x10] sm:$0xf] }
   0x4   :  { %177 = vmatpush.bf16.msra.mxu0 %v930_v3  ;;  %v926_v11 = vor.u32 %v1035_v8, %v923_v9  ;;  %v1034_v13 = vld [vmem:[%s1518_s1 + $0x14] sm:$0xf0]  ;;  %v1033_v14 = vld [vmem:[%s1518_s1 + $0x14] sm:$0xf]  ;;  %v915_v15 = vld [vmem:[%s1518_s1 + $0x18] sm:$0xf0] }
   0x5   :  { %266 = vmatpush.bf16.msra.mxu1 %v934_v7  ;;  %v914_v16 = vor.u32 %v1034_v13, %v913_v12 }
   0x8   :  { %178 = vmatpush.bf16.msra.mxu0 %v922_v10 }
   0x9   :  { %10 = vsyncpa [#allocation3], 0  ;;  %267 = vmatpush.bf16.msra.mxu1 %v926_v11  ;;  %v918_v17 = vor.u32 %v1033_v14, %v915_v15  ;;  %v905_v18 = vld [vmem:[%s1518_s1] sm:$0xf]  ;;  %v1032_v19 = vld [vmem:[%s1518_s1 + $0x4] sm:$0xf0] }
   0xa   :  { %v1031_v20 = vld [vmem:[%s1518_s1 + $0x4] sm:$0xf]  ;;  %v907_v21 = vld [vmem:[%s1518_s1 + $0x8] sm:$0xf0]  ;;  %v906_v22 = vor.u32 %v1032_v19, %v905_v18  ;;  %vm124_vm0 = vcmask 523264   ;;  %v24_v27 = vld [vmem:[%s1517_s0 + $0x10] sm:$0xff] }
   0xb   :  { %v22_v23 = vld [vmem:[%s1517_s0] sm:$0xff]  ;;  %v23_v24 = vld [vmem:[%s1517_s0 + $0x8] sm:$0xff]  ;;  %v910_v25 = vor.u32 %v1031_v20, %v907_v21  ;;  %v25_v28 = vld [vmem:[%s1517_s0 + $0x18] sm:$0xff]  ;;  %s891_s19 = sshll.u32 %s1522_s5, 4  ;;  %s1150_s20 = smov 128   ;;  %s892_s19 = int_to_ptr.hbm [resolvable:$true] %s891_s19 }
   0xc   :  { %179 = vmatpush.bf16.msra.mxu0 %v914_v16  ;;  %v54_v26 = vpack.c.bf16 %v23_v24, %v22_v23  ;;  %v55_v29 = vpack.c.bf16 %v25_v28, %v24_v27  ;;  %v26_v30 = vld [vmem:[%s1517_s0 + $0x20] sm:$0xff]  ;;  %v27_v31 = vld [vmem:[%s1517_s0 + $0x28] sm:$0xff]  ;;  %v28_v33 = vld [vmem:[%s1517_s0 + $0x30] sm:$0xff]  ;;  %s1151_s21 = smov 8  }
   0xd   :  { %268 = vmatpush.bf16.msra.mxu1 %v918_v17  ;;  %v56_v32 = vpack.c.bf16 %v27_v31, %v26_v30  ;;  %v29_v34 = vld [vmem:[%s1517_s0 + $0x38] sm:$0xff]  ;;  %v30_v36 = vld [vmem:[%s1517_s0 + $0x40] sm:$0xff]  ;;  %v31_v37 = vld [vmem:[%s1517_s0 + $0x48] sm:$0xff] }
   0xe   :  { %v57_v35 = vpack.c.bf16 %v29_v34, %v28_v33  ;;  %v58_v38 = vpack.c.bf16 %v31_v37, %v30_v36  ;;  %v1046_v39 = vld [vmem:[%s1520_s3 + $0x38] sm:$0xff]  ;;  %v32_v41 = vld [vmem:[%s1517_s0 + $0x50] sm:$0xff]  ;;  %v1044_v46 = vld [vmem:[%s1520_s3 + $0x28] sm:$0xff] }
   0xf   :  { %v1054_v40 = vld [vmem:[%s1520_s3 + $0x78] sm:$0xff]  ;;  %643 = vmatpush.bf16.msra.mxu2 %v1046_v39  ;;  %v1045_v44 = vld [vmem:[%s1520_s3 + $0x30] sm:$0xff]  ;;  %v1052_v47 = vld [vmem:[%s1520_s3 + $0x68] sm:$0xff] }
  0x10   :  { %180 = vmatpush.bf16.msra.mxu0 %v906_v22  ;;  %732 = vmatpush.bf16.msra.mxu3 %v1054_v40  ;;  %v33_v42 = vld [vmem:[%s1517_s0 + $0x58] sm:$0xff]  ;;  %v1053_v45 = vld [vmem:[%s1520_s3 + $0x70] sm:$0xff]  ;;  %v1043_v48 = vld [vmem:[%s1520_s3 + $0x20] sm:$0xff] }
  0x11   :  { %269 = vmatpush.bf16.msra.mxu1 %v910_v25  ;;  %v59_v43 = vpack.c.bf16 %v33_v42, %v32_v41  ;;  %v1051_v49 = vld [vmem:[%s1520_s3 + $0x60] sm:$0xff]  ;;  %v35_v51 = vld [vmem:[%s1517_s0 + $0x68] sm:$0xff]  ;;  %v1042_v53 = vld [vmem:[%s1520_s3 + $0x18] sm:$0xff] }
  0x12   :  { %v34_v50 = vld [vmem:[%s1517_s0 + $0x60] sm:$0xff]  ;;  %v1050_v54 = vld [vmem:[%s1520_s3 + $0x58] sm:$0xff]  ;;  %v1041_v55 = vld [vmem:[%s1520_s3 + $0x10] sm:$0xff] }
  0x13   :  { %935 = vmatmul.msk.bf16.vlgmr.msra.gmra.mxu0 %vm124_vm0, %v54_v26  ;;  %644 = vmatpush.bf16.msra.mxu2 %v1045_v44  ;;  %v60_v52 = vpack.c.bf16 %v35_v51, %v34_v50  ;;  %v1049_v56 = vld [vmem:[%s1520_s3 + $0x50] sm:$0xff]  ;;  %v1040_v57 = vld [vmem:[%s1520_s3 + $0x8] sm:$0xff]  ;;  %v37_v60 = vld [vmem:[%s1517_s0 + $0x78] sm:$0xff] }
  0x14   :  { %951 = vmatmul.msk.bf16.vlgmr.msra.gmra.mxu1 %vm124_vm0, %v54_v26  ;;  %733 = vmatpush.bf16.msra.mxu3 %v1053_v45  ;;  %v1048_v58 = vld [vmem:[%s1520_s3 + $0x48] sm:$0xff]  ;;  %v36_v59 = vld [vmem:[%s1517_s0 + $0x70] sm:$0xff]  ;;  %v1039_v61 = vld [vmem:[%s1520_s3] sm:$0xff] }
  0x15   :  { %v1047_v62 = vld [vmem:[%s1520_s3 + $0x40] sm:$0xff]  ;;  %v61_v63 = vpack.c.bf16 %v37_v60, %v36_v59  ;;  %v39_v1 = vld [vmem:[%s1517_s0 + $0x88] sm:$0xff]  ;;  %v40_v18 = vld [vmem:[%s1517_s0 + $0x90] sm:$0xff] }
  0x16   :  { %v38_v0 = vld [vmem:[%s1517_s0 + $0x80] sm:$0xff]  ;;  %v41_v19 = vld [vmem:[%s1517_s0 + $0x98] sm:$0xff]  ;;  %v43_v40 = vld [vmem:[%s1517_s0 + $0xa8] sm:$0xff] }
  0x17   :  { %645 = vmatpush.bf16.msra.mxu2 %v1044_v46  ;;  %v78_v2 = vld [vmem:[%s1519_s2] sm:$0x3]  ;;  %v62_v3 = vpack.c.bf16 %v39_v1, %v38_v0  ;;  %v63_v25 = vpack.c.bf16 %v41_v19, %v40_v18  ;;  %v44_v60 = vld [vmem:[%s1517_s0 + $0xb0] sm:$0xff] }
  0x18   :  { %734 = vmatpush.bf16.msra.mxu3 %v1052_v47  ;;  %v1351_v5 = vperm.slane %v78_v2, 0  ;;  %v1353_v7 = vperm.slane %v78_v2, 1  ;;  %v42_v39 = vld [vmem:[%s1517_s0 + $0xa0] sm:$0xff] }
  0x19   :  { %v64_v46 = vpack.c.bf16 %v43_v40, %v42_v39  ;;  %v46_v19 = vld [vmem:[%s1517_s0 + $0xc0] sm:$0xff]  ;;  %v48_v40 = vld [vmem:[%s1517_s0 + $0xd0] sm:$0xff] }
  0x1b   :  { %646 = vmatpush.bf16.msra.mxu2 %v1043_v48 }
  0x1c   :  { %735 = vmatpush.bf16.msra.mxu3 %v1051_v49 }
  0x1f   :  { %647 = vmatpush.bf16.msra.mxu2 %v1042_v53 }
  0x20   :  { %736 = vmatpush.bf16.msra.mxu3 %v1050_v54 }
  0x23   :  { %936 = vmatmul.msk.bf16.gmra.mxu0 %vm124_vm0, %v55_v29  ;;  %648 = vmatpush.bf16.msra.mxu2 %v1041_v55 }
  0x24   :  { %952 = vmatmul.msk.bf16.gmra.mxu1 %vm124_vm0, %v55_v29  ;;  %737 = vmatpush.bf16.msra.mxu3 %v1049_v56 }
  0x27   :  { %649 = vmatpush.bf16.msra.mxu2 %v1040_v57 }
  0x28   :  { %738 = vmatpush.bf16.msra.mxu3 %v1048_v58 }
  0x2b   :  { %650 = vmatpush.bf16.msra.mxu2 %v1039_v61  ;;  %v45_v61 = vld [vmem:[%s1517_s0 + $0xb8] sm:$0xff] }
  0x2c   :  { %739 = vmatpush.bf16.msra.mxu3 %v1047_v62 }
  0x33   :  { %937 = vmatmul.msk.bf16.gmra.mxu0 %vm124_vm0, %v56_v32 }
  0x34   :  { %953 = vmatmul.msk.bf16.gmra.mxu1 %vm124_vm0, %v56_v32 }
  0x43   :  { %938 = vmatmul.msk.bf16.gmra.mxu0 %vm124_vm0, %v57_v35 }
  0x44   :  { %954 = vmatmul.msk.bf16.gmra.mxu1 %vm124_vm0, %v57_v35 }
  0x53   :  { %939 = vmatmul.msk.bf16.gmra.mxu0 %vm124_vm0, %v58_v38 }
  0x54   :  { %955 = vmatmul.msk.bf16.gmra.mxu1 %vm124_vm0, %v58_v38 }
  0x63   :  { %940 = vmatmul.msk.bf16.gmra.mxu0 %vm124_vm0, %v59_v43 }
  0x64   :  { %956 = vmatmul.msk.bf16.gmra.mxu1 %vm124_vm0, %v59_v43 }
  0x73   :  { %941 = vmatmul.msk.bf16.gmra.mxu0 %vm124_vm0, %v60_v52 }
  0x74   :  { %957 = vmatmul.msk.bf16.gmra.mxu1 %vm124_vm0, %v60_v52 }
  0x83   :  { %942 = vmatmul.msk.bf16.gmra.mxu0 %vm124_vm0, %v61_v63 }
  0x84   :  { %958 = vmatmul.msk.bf16.gmra.mxu1 %vm124_vm0, %v61_v63 }
  0x90   :  { %v182_v4 = vpop.f32.mrf.mxu0 }
  0x91   :  { %v271_v6 = vpop.f32.mrf.mxu1  ;;  %v183_v8 = vadd.f32 %v182_v4, %v1351_v5 }
  0x92   :  { %v272_v9 = vadd.f32 %v271_v6, %v1353_v7 }
  0x93   :  { %943 = vmatmul.msk.bf16.gmra.mxu0 %vm124_vm0, %v62_v3  ;;  %v351_v11 = vmul.f32 0.2, %v183_v8 }
  0x94   :  { %959 = vmatmul.msk.bf16.gmra.mxu1 %vm124_vm0, %v62_v3  ;;  %v352_v14 = vmul.f32 0.2, %v272_v9  ;;  %v65_v3 = vpack.c.bf16 %v45_v61, %v44_v60  ;;  %v50_v61 = vld [vmem:[%s1517_s0 + $0xe0] sm:$0xff] }
  0x95   :  { %v415_v20 = vmax.f32 %v183_v8, %v351_v11 }
  0x96   :  { %v416_v22 = vmax.f32 %v272_v9, %v352_v14 }
  0x98   :  { %v184_v10 = vpop.f32.mrf.mxu0 }
  0x99   :  { %v185_v12 = vadd.f32 %v184_v10, %v1351_v5  ;;  %v273_v13 = vpop.f32.mrf.mxu1 }
  0x9a   :  { %v274_v15 = vadd.f32 %v273_v13, %v1353_v7 }
  0x9b   :  { %v353_v16 = vmul.f32 0.2, %v185_v12 }
  0x9c   :  { %v354_v17 = vmul.f32 0.2, %v274_v15 }
  0x9d   :  { %v417_v21 = vmax.f32 %v185_v12, %v353_v16 }
  0x9e   :  { %v418_v23 = vmax.f32 %v274_v15, %v354_v17 }
  0x9f   :  { %v479_v24 = vpack.c.bf16 %v417_v21, %v415_v20  ;;  %v47_v20 = vld [vmem:[%s1517_s0 + $0xc8] sm:$0xff] }
  0xa0   :  { %v187_v26 = vpop.f32.mrf.mxu0  ;;  %v480_v27 = vpack.c.bf16 %v418_v23, %v416_v22 }
  0xa1   :  { %v276_v28 = vpop.f32.mrf.mxu1  ;;  %651 = vmatmul.bf16.vlgmr.msra.gmra.mxu2 %v479_v24  ;;  %v188_v29 = vadd.f32 %v187_v26, %v1351_v5  ;;  %v66_v26 = vpack.c.bf16 %v47_v20, %v46_v19  ;;  %v52_v20 = vld [vmem:[%s1517_s0 + $0xf0] sm:$0xff] }
  0xa2   :  { %740 = vmatmul.bf16.vlgmr.msra.gmra.mxu3 %v480_v27  ;;  %v277_v30 = vadd.f32 %v276_v28, %v1353_v7 }
  0xa3   :  { %944 = vmatmul.msk.bf16.gmra.mxu0 %vm124_vm0, %v63_v25  ;;  %v355_v32 = vmul.f32 0.2, %v188_v29 }
  0xa4   :  { %960 = vmatmul.msk.bf16.gmra.mxu1 %vm124_vm0, %v63_v25  ;;  %v356_v35 = vmul.f32 0.2, %v277_v30 }
  0xa5   :  { %v419_v41 = vmax.f32 %v188_v29, %v355_v32 }
  0xa6   :  { %v420_v43 = vmax.f32 %v277_v30, %v356_v35 }
  0xa8   :  { %v189_v31 = vpop.f32.mrf.mxu0 }
  0xa9   :  { %v190_v33 = vadd.f32 %v189_v31, %v1351_v5  ;;  %v278_v34 = vpop.f32.mrf.mxu1 }
  0xaa   :  { %v279_v36 = vadd.f32 %v278_v34, %v1353_v7 }
  0xab   :  { %v357_v37 = vmul.f32 0.2, %v190_v33 }
  0xac   :  { %v358_v38 = vmul.f32 0.2, %v279_v36 }
  0xad   :  { %v421_v42 = vmax.f32 %v190_v33, %v357_v37 }
  0xae   :  { %v422_v44 = vmax.f32 %v279_v36, %v358_v38 }
  0xaf   :  { %v481_v45 = vpack.c.bf16 %v421_v42, %v419_v41  ;;  %v49_v41 = vld [vmem:[%s1517_s0 + $0xd8] sm:$0xff] }
  0xb0   :  { %v192_v47 = vpop.f32.mrf.mxu0  ;;  %v482_v48 = vpack.c.bf16 %v422_v44, %v420_v43 }
  0xb1   :  { %v281_v49 = vpop.f32.mrf.mxu1  ;;  %656 = vmatmul.bf16.gmra.mxu2 %v481_v45  ;;  %v193_v50 = vadd.f32 %v192_v47, %v1351_v5  ;;  %v67_v47 = vpack.c.bf16 %v49_v41, %v48_v40 }
  0xb2   :  { %745 = vmatmul.bf16.gmra.mxu3 %v482_v48  ;;  %v282_v51 = vadd.f32 %v281_v49, %v1353_v7 }
  0xb3   :  { %945 = vmatmul.msk.bf16.gmra.mxu0 %vm124_vm0, %v64_v46  ;;  %v359_v53 = vmul.f32 0.2, %v193_v50 }
  0xb4   :  { %961 = vmatmul.msk.bf16.gmra.mxu1 %vm124_vm0, %v64_v46  ;;  %v360_v56 = vmul.f32 0.2, %v282_v51 }
  0xb5   :  { %v423_v62 = vmax.f32 %v193_v50, %v359_v53 }
  0xb6   :  { %v424_v0 = vmax.f32 %v282_v51, %v360_v56 }
  0xb8   :  { %v194_v52 = vpop.f32.mrf.mxu0 }
  0xb9   :  { %v195_v54 = vadd.f32 %v194_v52, %v1351_v5  ;;  %v283_v55 = vpop.f32.mrf.mxu1 }
  0xba   :  { %v284_v57 = vadd.f32 %v283_v55, %v1353_v7 }
  0xbb   :  { %v361_v58 = vmul.f32 0.2, %v195_v54 }
  0xbc   :  { %v362_v59 = vmul.f32 0.2, %v284_v57 }
  0xbd   :  { %v425_v63 = vmax.f32 %v195_v54, %v361_v58 }
  0xbe   :  { %v426_v1 = vmax.f32 %v284_v57, %v362_v59 }
  0xbf   :  { %v483_v2 = vpack.c.bf16 %v425_v63, %v423_v62  ;;  %v51_v62 = vld [vmem:[%s1517_s0 + $0xe8] sm:$0xff] }
  0xc0   :  { %v197_v4 = vpop.f32.mrf.mxu0  ;;  %v484_v6 = vpack.c.bf16 %v426_v1, %v424_v0 }
  0xc1   :  { %v286_v8 = vpop.f32.mrf.mxu1  ;;  %661 = vmatmul.bf16.gmra.mxu2 %v483_v2  ;;  %v198_v9 = vadd.f32 %v197_v4, %v1351_v5  ;;  %v68_v4 = vpack.c.bf16 %v51_v62, %v50_v61 }
  0xc2   :  { %750 = vmatmul.bf16.gmra.mxu3 %v484_v6  ;;  %v287_v10 = vadd.f32 %v286_v8, %v1353_v7 }
  0xc3   :  { %946 = vmatmul.msk.bf16.gmra.mxu0 %vm124_vm0, %v65_v3  ;;  %v363_v12 = vmul.f32 0.2, %v198_v9 }
  0xc4   :  { %962 = vmatmul.msk.bf16.gmra.mxu1 %vm124_vm0, %v65_v3  ;;  %v364_v15 = vmul.f32 0.2, %v287_v10 }
  0xc5   :  { %v427_v21 = vmax.f32 %v198_v9, %v363_v12 }
  0xc6   :  { %v428_v23 = vmax.f32 %v287_v10, %v364_v15 }
  0xc8   :  { %v199_v11 = vpop.f32.mrf.mxu0 }
  0xc9   :  { %v200_v13 = vadd.f32 %v199_v11, %v1351_v5  ;;  %v288_v14 = vpop.f32.mrf.mxu1 }
  0xca   :  { %v289_v16 = vadd.f32 %v288_v14, %v1353_v7 }
  0xcb   :  { %v365_v17 = vmul.f32 0.2, %v200_v13 }
  0xcc   :  { %v366_v18 = vmul.f32 0.2, %v289_v16 }
  0xcd   :  { %v429_v22 = vmax.f32 %v200_v13, %v365_v17 }
  0xce   :  { %v430_v24 = vmax.f32 %v289_v16, %v366_v18 }
  0xcf   :  { %v485_v25 = vpack.c.bf16 %v429_v22, %v427_v21  ;;  %v53_v21 = vld [vmem:[%s1517_s0 + $0xf8] sm:$0xff] }
  0xd0   :  { %v202_v27 = vpop.f32.mrf.mxu0  ;;  %v486_v28 = vpack.c.bf16 %v430_v24, %v428_v23 }
  0xd1   :  { %v291_v29 = vpop.f32.mrf.mxu1  ;;  %666 = vmatmul.bf16.gmra.mxu2 %v485_v25  ;;  %v203_v30 = vadd.f32 %v202_v27, %v1351_v5  ;;  %v69_v27 = vpack.c.bf16 %v53_v21, %v52_v20 }
  0xd2   :  { %755 = vmatmul.bf16.gmra.mxu3 %v486_v28  ;;  %v292_v31 = vadd.f32 %v291_v29, %v1353_v7 }
  0xd3   :  { %947 = vmatmul.msk.bf16.gmra.mxu0 %vm124_vm0, %v66_v26  ;;  %v367_v33 = vmul.f32 0.2, %v203_v30 }
  0xd4   :  { %963 = vmatmul.msk.bf16.gmra.mxu1 %vm124_vm0, %v66_v26  ;;  %v368_v36 = vmul.f32 0.2, %v292_v31 }
  0xd5   :  { %v431_v42 = vmax.f32 %v203_v30, %v367_v33 }
  0xd6   :  { %v432_v44 = vmax.f32 %v292_v31, %v368_v36 }
  0xd8   :  { %v204_v32 = vpop.f32.mrf.mxu0 }
  0xd9   :  { %v205_v34 = vadd.f32 %v204_v32, %v1351_v5  ;;  %v293_v35 = vpop.f32.mrf.mxu1 }
  0xda   :  { %v294_v37 = vadd.f32 %v293_v35, %v1353_v7 }
  0xdb   :  { %v369_v38 = vmul.f32 0.2, %v205_v34 }
  0xdc   :  { %v370_v39 = vmul.f32 0.2, %v294_v37 }
  0xdd   :  { %v433_v43 = vmax.f32 %v205_v34, %v369_v38 }
  0xde   :  { %v434_v45 = vmax.f32 %v294_v37, %v370_v39 }
  0xdf   :  { %v487_v46 = vpack.c.bf16 %v433_v43, %v431_v42 }
  0xe0   :  { %v207_v48 = vpop.f32.mrf.mxu0  ;;  %v488_v49 = vpack.c.bf16 %v434_v45, %v432_v44 }
  0xe1   :  { %v296_v50 = vpop.f32.mrf.mxu1  ;;  %671 = vmatmul.bf16.gmra.mxu2 %v487_v46  ;;  %v208_v51 = vadd.f32 %v207_v48, %v1351_v5 }
  0xe2   :  { %760 = vmatmul.bf16.gmra.mxu3 %v488_v49  ;;  %v297_v52 = vadd.f32 %v296_v50, %v1353_v7 }
  0xe3   :  { %948 = vmatmul.msk.bf16.gmra.mxu0 %vm124_vm0, %v67_v47  ;;  %v371_v54 = vmul.f32 0.2, %v208_v51 }
  0xe4   :  { %964 = vmatmul.msk.bf16.gmra.mxu1 %vm124_vm0, %v67_v47  ;;  %v372_v57 = vmul.f32 0.2, %v297_v52 }
  0xe5   :  { %v435_v63 = vmax.f32 %v208_v51, %v371_v54 }
  0xe6   :  { %v436_v1 = vmax.f32 %v297_v52, %v372_v57 }
  0xe8   :  { %v209_v53 = vpop.f32.mrf.mxu0 }
  0xe9   :  { %v210_v55 = vadd.f32 %v209_v53, %v1351_v5  ;;  %v298_v56 = vpop.f32.mrf.mxu1 }
  0xea   :  { %v299_v58 = vadd.f32 %v298_v56, %v1353_v7 }
  0xeb   :  { %v373_v59 = vmul.f32 0.2, %v210_v55 }
  0xec   :  { %v374_v60 = vmul.f32 0.2, %v299_v58 }
  0xed   :  { %v437_v0 = vmax.f32 %v210_v55, %v373_v59 }
  0xee   :  { %v438_v2 = vmax.f32 %v299_v58, %v374_v60 }
  0xef   :  { %v489_v3 = vpack.c.bf16 %v437_v0, %v435_v63 }
  0xf0   :  { %v212_v6 = vpop.f32.mrf.mxu0  ;;  %v490_v8 = vpack.c.bf16 %v438_v2, %v436_v1 }
  0xf1   :  { %v301_v9 = vpop.f32.mrf.mxu1  ;;  %676 = vmatmul.bf16.gmra.mxu2 %v489_v3  ;;  %v213_v10 = vadd.f32 %v212_v6, %v1351_v5  ;;  %v1452_v3 = vld [vmem:[%s1521_s4] ss:$0 sm:$0xff]  ;;  %s1149_s4 = smov [#allocation2]  }
  0xf2   :  { %765 = vmatmul.bf16.gmra.mxu3 %v490_v8  ;;  %v302_v11 = vadd.f32 %v301_v9, %v1353_v7  ;;  %s889_s3 = sshll.u32 %s1149_s4, 4  ;;  %s890_s3 = int_to_ptr.vmem [resolvable:$true] %s889_s3 }
  0xf3   :  { %949 = vmatmul.msk.bf16.gmra.mxu0 %vm124_vm0, %v68_v4  ;;  %v375_v13 = vmul.f32 0.2, %v213_v10 }
  0xf4   :  { %965 = vmatmul.msk.bf16.gmra.mxu1 %vm124_vm0, %v68_v4  ;;  %v376_v16 = vmul.f32 0.2, %v302_v11 }
  0xf5   :  { %v439_v22 = vmax.f32 %v213_v10, %v375_v13 }
  0xf6   :  { %v440_v24 = vmax.f32 %v302_v11, %v376_v16 }
  0xf8   :  { %v214_v12 = vpop.f32.mrf.mxu0 }
  0xf9   :  { %v215_v14 = vadd.f32 %v214_v12, %v1351_v5  ;;  %v303_v15 = vpop.f32.mrf.mxu1 }
  0xfa   :  { %v304_v17 = vadd.f32 %v303_v15, %v1353_v7 }
  0xfb   :  { %v377_v18 = vmul.f32 0.2, %v215_v14 }
  0xfc   :  { %v378_v19 = vmul.f32 0.2, %v304_v17 }
  0xfd   :  { %v441_v23 = vmax.f32 %v215_v14, %v377_v18 }
  0xfe   :  { %v442_v25 = vmax.f32 %v304_v17, %v378_v19 }
  0xff   :  { %v491_v26 = vpack.c.bf16 %v441_v23, %v439_v22 }
 0x100   :  { %v217_v28 = vpop.f32.mrf.mxu0  ;;  %v492_v29 = vpack.c.bf16 %v442_v25, %v440_v24 }
 0x101   :  { %v306_v30 = vpop.f32.mrf.mxu1  ;;  %681 = vmatmul.bf16.gmra.mxu2 %v491_v26  ;;  %v218_v31 = vadd.f32 %v217_v28, %v1351_v5 }
 0x102   :  { %770 = vmatmul.bf16.gmra.mxu3 %v492_v29  ;;  %v307_v32 = vadd.f32 %v306_v30, %v1353_v7 }
 0x103   :  { %950 = vmatmul.msk.bf16.gmra.mxu0 %vm124_vm0, %v69_v27  ;;  %v379_v34 = vmul.f32 0.2, %v218_v31 }
 0x104   :  { %966 = vmatmul.msk.bf16.gmra.mxu1 %vm124_vm0, %v69_v27  ;;  %v380_v37 = vmul.f32 0.2, %v307_v32 }
 0x105   :  { %v443_v41 = vmax.f32 %v218_v31, %v379_v34 }
 0x106   :  { %v444_v43 = vmax.f32 %v307_v32, %v380_v37 }
 0x108   :  { %v219_v33 = vpop.f32.mrf.mxu0 }
 0x109   :  { %v220_v35 = vadd.f32 %v219_v33, %v1351_v5  ;;  %v308_v36 = vpop.f32.mrf.mxu1 }
 0x10a   :  { %v309_v38 = vadd.f32 %v308_v36, %v1353_v7 }
 0x10b   :  { %v381_v39 = vmul.f32 0.2, %v220_v35 }
 0x10c   :  { %v382_v40 = vmul.f32 0.2, %v309_v38 }
 0x10d   :  { %v445_v42 = vmax.f32 %v220_v35, %v381_v39 }
 0x10e   :  { %v446_v44 = vmax.f32 %v309_v38, %v382_v40 }
 0x10f   :  { %v493_v45 = vpack.c.bf16 %v445_v42, %v443_v41 }
 0x110   :  { %v222_v46 = vpop.f32.mrf.mxu0  ;;  %v494_v47 = vpack.c.bf16 %v446_v44, %v444_v43 }
 0x111   :  { %v311_v48 = vpop.f32.mrf.mxu1  ;;  %686 = vmatmul.bf16.gmra.mxu2 %v493_v45  ;;  %v223_v49 = vadd.f32 %v222_v46, %v1351_v5 }
 0x112   :  { %775 = vmatmul.bf16.gmra.mxu3 %v494_v47  ;;  %v312_v50 = vadd.f32 %v311_v48, %v1353_v7 }
 0x113   :  { %v383_v52 = vmul.f32 0.2, %v223_v49 }
 0x114   :  { %v384_v55 = vmul.f32 0.2, %v312_v50 }
 0x115   :  { %v447_v59 = vmax.f32 %v223_v49, %v383_v52 }
 0x116   :  { %v448_v61 = vmax.f32 %v312_v50, %v384_v55 }
 0x118   :  { %v224_v51 = vpop.f32.mrf.mxu0 }
 0x119   :  { %v225_v53 = vadd.f32 %v224_v51, %v1351_v5  ;;  %v313_v54 = vpop.f32.mrf.mxu1 }
 0x11a   :  { %v314_v56 = vadd.f32 %v313_v54, %v1353_v7 }
 0x11b   :  { %v385_v57 = vmul.f32 0.2, %v225_v53 }
 0x11c   :  { %v386_v58 = vmul.f32 0.2, %v314_v56 }
 0x11d   :  { %v449_v60 = vmax.f32 %v225_v53, %v385_v57 }
 0x11e   :  { %v450_v62 = vmax.f32 %v314_v56, %v386_v58 }
 0x11f   :  { %v495_v63 = vpack.c.bf16 %v449_v60, %v447_v59 }
 0x120   :  { %v227_v0 = vpop.f32.mrf.mxu0  ;;  %v496_v1 = vpack.c.bf16 %v450_v62, %v448_v61 }
 0x121   :  { %v316_v2 = vpop.f32.mrf.mxu1  ;;  %691 = vmatmul.bf16.gmra.mxu2 %v495_v63  ;;  %v228_v6 = vadd.f32 %v227_v0, %v1351_v5 }
 0x122   :  { %780 = vmatmul.bf16.gmra.mxu3 %v496_v1  ;;  %v317_v10 = vadd.f32 %v316_v2, %v1353_v7 }
 0x123   :  { %v387_v13 = vmul.f32 0.2, %v228_v6 }
 0x124   :  { %v652_v4 = vpop.f32.mrf.mxu2  ;;  %v388_v16 = vmul.f32 0.2, %v317_v10 }
 0x125   :  { %v653_v8 = vadd.f32 %v1452_v3, %v652_v4  ;;  %v741_v9 = vpop.f32.mrf.mxu3  ;;  %v451_v21 = vmax.f32 %v228_v6, %v387_v13 }
 0x126   :  { %v452_v25 = vmax.f32 %v317_v10, %v388_v16 }
 0x127   :  { %v742_v11 = vadd.f32 %v741_v9, %v653_v8 }
 0x128   :  { %v229_v12 = vpop.f32.mrf.mxu0 }
 0x129   :  { %1059 = vtanh.f32 %v742_v11  ;;  %v230_v14 = vadd.f32 %v229_v12, %v1351_v5  ;;  %v318_v15 = vpop.f32.mrf.mxu1 }
 0x12a   :  { %v319_v17 = vadd.f32 %v318_v15, %v1353_v7 }
 0x12b   :  { %v389_v18 = vmul.f32 0.2, %v230_v14 }
 0x12c   :  { %v390_v19 = vmul.f32 0.2, %v319_v17  ;;  %v654_v20 = vpop.f32.mrf.mxu2 }
 0x12d   :  { %v453_v22 = vmax.f32 %v230_v14, %v389_v18  ;;  %v655_v23 = vadd.f32 %v1452_v3, %v654_v20  ;;  %v743_v24 = vpop.f32.mrf.mxu3 }
 0x12e   :  { %v454_v26 = vmax.f32 %v319_v17, %v390_v19 }
 0x12f   :  { %v1060_v27 = vpop.eup %1059  ;;  %v744_v28 = vadd.f32 %v743_v24, %v655_v23  ;;  %v497_v29 = vpack.c.bf16 %v453_v22, %v451_v21 }
 0x130   :  { %853 = vst [vmem:[#allocation2] sm:$0xff] %v1060_v27  ;;  %v232_v30 = vpop.f32.mrf.mxu0  ;;  %v498_v31 = vpack.c.bf16 %v454_v26, %v452_v25 }
 0x131   :  { %1061 = vtanh.f32 %v744_v28  ;;  %v321_v32 = vpop.f32.mrf.mxu1  ;;  %696 = vmatmul.bf16.gmra.mxu2 %v497_v29  ;;  %v233_v34 = vadd.f32 %v232_v30, %v1351_v5 }
 0x132   :  { %785 = vmatmul.bf16.gmra.mxu3 %v498_v31  ;;  %v322_v37 = vadd.f32 %v321_v32, %v1353_v7 }
 0x133   :  { %v391_v41 = vmul.f32 0.2, %v233_v34 }
 0x134   :  { %v657_v33 = vpop.f32.mrf.mxu2  ;;  %v392_v44 = vmul.f32 0.2, %v322_v37 }
 0x135   :  { %v658_v35 = vadd.f32 %v1452_v3, %v657_v33  ;;  %v746_v36 = vpop.f32.mrf.mxu3  ;;  %v455_v49 = vmax.f32 %v233_v34, %v391_v41 }
 0x136   :  { %v456_v53 = vmax.f32 %v322_v37, %v392_v44 }
 0x137   :  { %v1062_v38 = vpop.eup %1061  ;;  %v747_v39 = vadd.f32 %v746_v36, %v658_v35 }
 0x138   :  { %854 = vst [vmem:[#allocation2 + $0x8] sm:$0xff] %v1062_v38  ;;  %v234_v40 = vpop.f32.mrf.mxu0 }
 0x139   :  { %1063 = vtanh.f32 %v747_v39  ;;  %v235_v42 = vadd.f32 %v234_v40, %v1351_v5  ;;  %v323_v43 = vpop.f32.mrf.mxu1 }
 0x13a   :  { %v324_v45 = vadd.f32 %v323_v43, %v1353_v7 }
 0x13b   :  { %v393_v46 = vmul.f32 0.2, %v235_v42 }
 0x13c   :  { %v394_v47 = vmul.f32 0.2, %v324_v45  ;;  %v659_v48 = vpop.f32.mrf.mxu2 }
 0x13d   :  { %v457_v50 = vmax.f32 %v235_v42, %v393_v46  ;;  %v660_v51 = vadd.f32 %v1452_v3, %v659_v48  ;;  %v748_v52 = vpop.f32.mrf.mxu3 }
 0x13e   :  { %v458_v54 = vmax.f32 %v324_v45, %v394_v47 }
 0x13f   :  { %v1064_v55 = vpop.eup %1063  ;;  %v749_v56 = vadd.f32 %v748_v52, %v660_v51  ;;  %v499_v57 = vpack.c.bf16 %v457_v50, %v455_v49 }
 0x140   :  { %855 = vst [vmem:[#allocation2 + $0x10] sm:$0xff] %v1064_v55  ;;  %v237_v58 = vpop.f32.mrf.mxu0  ;;  %v500_v59 = vpack.c.bf16 %v458_v54, %v456_v53 }
 0x141   :  { %1065 = vtanh.f32 %v749_v56  ;;  %v326_v60 = vpop.f32.mrf.mxu1  ;;  %701 = vmatmul.bf16.gmra.mxu2 %v499_v57  ;;  %v238_v62 = vadd.f32 %v237_v58, %v1351_v5 }
 0x142   :  { %790 = vmatmul.bf16.gmra.mxu3 %v500_v59  ;;  %v327_v1 = vadd.f32 %v326_v60, %v1353_v7 }
 0x143   :  { %v395_v8 = vmul.f32 0.2, %v238_v62 }
 0x144   :  { %v662_v61 = vpop.f32.mrf.mxu2  ;;  %v396_v11 = vmul.f32 0.2, %v327_v1 }
 0x145   :  { %v663_v63 = vadd.f32 %v1452_v3, %v662_v61  ;;  %v751_v0 = vpop.f32.mrf.mxu3  ;;  %v459_v16 = vmax.f32 %v238_v62, %v395_v8 }
 0x146   :  { %v460_v20 = vmax.f32 %v327_v1, %v396_v11 }
 0x147   :  { %v1066_v2 = vpop.eup %1065  ;;  %v752_v4 = vadd.f32 %v751_v0, %v663_v63 }
 0x148   :  { %856 = vst [vmem:[#allocation2 + $0x18] sm:$0xff] %v1066_v2  ;;  %v239_v6 = vpop.f32.mrf.mxu0 }
 0x149   :  { %1067 = vtanh.f32 %v752_v4  ;;  %v240_v9 = vadd.f32 %v239_v6, %v1351_v5  ;;  %v328_v10 = vpop.f32.mrf.mxu1 }
 0x14a   :  { %v329_v12 = vadd.f32 %v328_v10, %v1353_v7 }
 0x14b   :  { %v397_v13 = vmul.f32 0.2, %v240_v9 }
 0x14c   :  { %v398_v14 = vmul.f32 0.2, %v329_v12  ;;  %v664_v15 = vpop.f32.mrf.mxu2 }
 0x14d   :  { %v461_v17 = vmax.f32 %v240_v9, %v397_v13  ;;  %v665_v18 = vadd.f32 %v1452_v3, %v664_v15  ;;  %v753_v19 = vpop.f32.mrf.mxu3 }
 0x14e   :  { %v462_v21 = vmax.f32 %v329_v12, %v398_v14 }
 0x14f   :  { %v1068_v22 = vpop.eup %1067  ;;  %v754_v23 = vadd.f32 %v753_v19, %v665_v18  ;;  %v501_v24 = vpack.c.bf16 %v461_v17, %v459_v16 }
 0x150   :  { %857 = vst [vmem:[#allocation2 + $0x20] sm:$0xff] %v1068_v22  ;;  %v242_v25 = vpop.f32.mrf.mxu0  ;;  %v502_v26 = vpack.c.bf16 %v462_v21, %v460_v20 }
 0x151   :  { %1069 = vtanh.f32 %v754_v23  ;;  %v331_v27 = vpop.f32.mrf.mxu1  ;;  %706 = vmatmul.bf16.gmra.mxu2 %v501_v24  ;;  %v243_v29 = vadd.f32 %v242_v25, %v1351_v5 }
 0x152   :  { %795 = vmatmul.bf16.gmra.mxu3 %v502_v26  ;;  %v332_v32 = vadd.f32 %v331_v27, %v1353_v7 }
 0x153   :  { %v399_v36 = vmul.f32 0.2, %v243_v29 }
 0x154   :  { %v667_v28 = vpop.f32.mrf.mxu2  ;;  %v400_v39 = vmul.f32 0.2, %v332_v32 }
 0x155   :  { %v668_v30 = vadd.f32 %v1452_v3, %v667_v28  ;;  %v756_v31 = vpop.f32.mrf.mxu3  ;;  %v463_v44 = vmax.f32 %v243_v29, %v399_v36 }
 0x156   :  { %v464_v48 = vmax.f32 %v332_v32, %v400_v39 }
 0x157   :  { %v1070_v33 = vpop.eup %1069  ;;  %v757_v34 = vadd.f32 %v756_v31, %v668_v30 }
 0x158   :  { %858 = vst [vmem:[#allocation2 + $0x28] sm:$0xff] %v1070_v33  ;;  %v244_v35 = vpop.f32.mrf.mxu0 }
 0x159   :  { %1071 = vtanh.f32 %v757_v34  ;;  %v245_v37 = vadd.f32 %v244_v35, %v1351_v5  ;;  %v333_v38 = vpop.f32.mrf.mxu1 }
 0x15a   :  { %v334_v40 = vadd.f32 %v333_v38, %v1353_v7 }
 0x15b   :  { %v401_v41 = vmul.f32 0.2, %v245_v37 }
 0x15c   :  { %v402_v42 = vmul.f32 0.2, %v334_v40  ;;  %v669_v43 = vpop.f32.mrf.mxu2 }
 0x15d   :  { %v465_v45 = vmax.f32 %v245_v37, %v401_v41  ;;  %v670_v46 = vadd.f32 %v1452_v3, %v669_v43  ;;  %v758_v47 = vpop.f32.mrf.mxu3 }
 0x15e   :  { %v466_v49 = vmax.f32 %v334_v40, %v402_v42 }
 0x15f   :  { %v1072_v50 = vpop.eup %1071  ;;  %v759_v51 = vadd.f32 %v758_v47, %v670_v46  ;;  %v503_v52 = vpack.c.bf16 %v465_v45, %v463_v44 }
 0x160   :  { %859 = vst [vmem:[#allocation2 + $0x30] sm:$0xff] %v1072_v50  ;;  %v247_v53 = vpop.f32.mrf.mxu0  ;;  %v504_v54 = vpack.c.bf16 %v466_v49, %v464_v48 }
 0x161   :  { %1073 = vtanh.f32 %v759_v51  ;;  %v336_v55 = vpop.f32.mrf.mxu1  ;;  %711 = vmatmul.bf16.gmra.mxu2 %v503_v52  ;;  %v248_v57 = vadd.f32 %v247_v53, %v1351_v5 }
 0x162   :  { %800 = vmatmul.bf16.gmra.mxu3 %v504_v54  ;;  %v337_v60 = vadd.f32 %v336_v55, %v1353_v7 }
 0x163   :  { %v403_v0 = vmul.f32 0.2, %v248_v57 }
 0x164   :  { %v672_v56 = vpop.f32.mrf.mxu2  ;;  %v404_v4 = vmul.f32 0.2, %v337_v60 }
 0x165   :  { %v673_v58 = vadd.f32 %v1452_v3, %v672_v56  ;;  %v761_v59 = vpop.f32.mrf.mxu3  ;;  %v467_v11 = vmax.f32 %v248_v57, %v403_v0 }
 0x166   :  { %v468_v15 = vmax.f32 %v337_v60, %v404_v4 }
 0x167   :  { %v1074_v61 = vpop.eup %1073  ;;  %v762_v62 = vadd.f32 %v761_v59, %v673_v58 }
 0x168   :  { %860 = vst [vmem:[#allocation2 + $0x38] sm:$0xff] %v1074_v61  ;;  %v249_v63 = vpop.f32.mrf.mxu0 }
 0x169   :  { %1075 = vtanh.f32 %v762_v62  ;;  %v250_v1 = vadd.f32 %v249_v63, %v1351_v5  ;;  %v338_v2 = vpop.f32.mrf.mxu1 }
 0x16a   :  { %v339_v6 = vadd.f32 %v338_v2, %v1353_v7 }
 0x16b   :  { %v405_v8 = vmul.f32 0.2, %v250_v1 }
 0x16c   :  { %v406_v9 = vmul.f32 0.2, %v339_v6  ;;  %v674_v10 = vpop.f32.mrf.mxu2 }
 0x16d   :  { %v469_v12 = vmax.f32 %v250_v1, %v405_v8  ;;  %v675_v13 = vadd.f32 %v1452_v3, %v674_v10  ;;  %v763_v14 = vpop.f32.mrf.mxu3 }
 0x16e   :  { %v470_v16 = vmax.f32 %v339_v6, %v406_v9 }
 0x16f   :  { %v1076_v17 = vpop.eup %1075  ;;  %v764_v18 = vadd.f32 %v763_v14, %v675_v13  ;;  %v505_v19 = vpack.c.bf16 %v469_v12, %v467_v11 }
 0x170   :  { %861 = vst [vmem:[#allocation2 + $0x40] sm:$0xff] %v1076_v17  ;;  %v252_v20 = vpop.f32.mrf.mxu0  ;;  %v506_v21 = vpack.c.bf16 %v470_v16, %v468_v15 }
 0x171   :  { %1077 = vtanh.f32 %v764_v18  ;;  %v341_v22 = vpop.f32.mrf.mxu1  ;;  %716 = vmatmul.bf16.gmra.mxu2 %v505_v19  ;;  %v253_v24 = vadd.f32 %v252_v20, %v1351_v5 }
 0x172   :  { %805 = vmatmul.bf16.gmra.mxu3 %v506_v21  ;;  %v342_v27 = vadd.f32 %v341_v22, %v1353_v7 }
 0x173   :  { %v407_v31 = vmul.f32 0.2, %v253_v24 }
 0x174   :  { %v677_v23 = vpop.f32.mrf.mxu2  ;;  %v408_v34 = vmul.f32 0.2, %v342_v27 }
 0x175   :  { %v678_v25 = vadd.f32 %v1452_v3, %v677_v23  ;;  %v766_v26 = vpop.f32.mrf.mxu3  ;;  %v471_v39 = vmax.f32 %v253_v24, %v407_v31 }
 0x176   :  { %v472_v43 = vmax.f32 %v342_v27, %v408_v34 }
 0x177   :  { %v1078_v28 = vpop.eup %1077  ;;  %v767_v29 = vadd.f32 %v766_v26, %v678_v25 }
 0x178   :  { %862 = vst [vmem:[#allocation2 + $0x48] sm:$0xff] %v1078_v28  ;;  %v254_v30 = vpop.f32.mrf.mxu0 }
 0x179   :  { %1079 = vtanh.f32 %v767_v29  ;;  %v255_v32 = vadd.f32 %v254_v30, %v1351_v5  ;;  %v343_v33 = vpop.f32.mrf.mxu1 }
 0x17a   :  { %v344_v35 = vadd.f32 %v343_v33, %v1353_v7 }
 0x17b   :  { %v409_v36 = vmul.f32 0.2, %v255_v32 }
 0x17c   :  { %v410_v37 = vmul.f32 0.2, %v344_v35  ;;  %v679_v38 = vpop.f32.mrf.mxu2 }
 0x17d   :  { %v473_v40 = vmax.f32 %v255_v32, %v409_v36  ;;  %v680_v41 = vadd.f32 %v1452_v3, %v679_v38  ;;  %v768_v42 = vpop.f32.mrf.mxu3 }
 0x17e   :  { %v474_v44 = vmax.f32 %v344_v35, %v410_v37 }
 0x17f   :  { %v1080_v45 = vpop.eup %1079  ;;  %v769_v46 = vadd.f32 %v768_v42, %v680_v41  ;;  %v507_v47 = vpack.c.bf16 %v473_v40, %v471_v39 }
 0x180   :  { %863 = vst [vmem:[#allocation2 + $0x50] sm:$0xff] %v1080_v45  ;;  %v257_v48 = vpop.f32.mrf.mxu0  ;;  %v508_v49 = vpack.c.bf16 %v474_v44, %v472_v43 }
 0x181   :  { %1081 = vtanh.f32 %v769_v46  ;;  %v346_v50 = vpop.f32.mrf.mxu1  ;;  %721 = vmatmul.bf16.gmra.mxu2 %v507_v47  ;;  %v258_v52 = vadd.f32 %v257_v48, %v1351_v5 }
 0x182   :  { %810 = vmatmul.bf16.gmra.mxu3 %v508_v49  ;;  %v347_v55 = vadd.f32 %v346_v50, %v1353_v7 }
 0x183   :  { %v411_v59 = vmul.f32 0.2, %v258_v52 }
 0x184   :  { %v682_v51 = vpop.f32.mrf.mxu2  ;;  %v412_v62 = vmul.f32 0.2, %v347_v55 }
 0x185   :  { %v683_v53 = vadd.f32 %v1452_v3, %v682_v51  ;;  %v771_v54 = vpop.f32.mrf.mxu3  ;;  %v475_v4 = vmax.f32 %v258_v52, %v411_v59 }
 0x186   :  { %v476_v10 = vmax.f32 %v347_v55, %v412_v62 }
 0x187   :  { %v1082_v56 = vpop.eup %1081  ;;  %v772_v57 = vadd.f32 %v771_v54, %v683_v53 }
 0x188   :  { %864 = vst [vmem:[#allocation2 + $0x58] sm:$0xff] %v1082_v56  ;;  %v259_v58 = vpop.f32.mrf.mxu0 }
 0x189   :  { %1083 = vtanh.f32 %v772_v57  ;;  %v260_v60 = vadd.f32 %v259_v58, %v1351_v5  ;;  %v348_v61 = vpop.f32.mrf.mxu1 }
 0x18a   :  { %v349_v63 = vadd.f32 %v348_v61, %v1353_v7 }
 0x18b   :  { %v413_v0 = vmul.f32 0.2, %v260_v60 }
 0x18c   :  { %v414_v1 = vmul.f32 0.2, %v349_v63  ;;  %v684_v2 = vpop.f32.mrf.mxu2 }
 0x18d   :  { %v477_v6 = vmax.f32 %v260_v60, %v413_v0  ;;  %v685_v8 = vadd.f32 %v1452_v3, %v684_v2  ;;  %v773_v9 = vpop.f32.mrf.mxu3 }
 0x18e   :  { %v478_v11 = vmax.f32 %v349_v63, %v414_v1 }
 0x18f   :  { %v1084_v12 = vpop.eup %1083  ;;  %v774_v13 = vadd.f32 %v773_v9, %v685_v8  ;;  %v509_v14 = vpack.c.bf16 %v477_v6, %v475_v4 }
 0x190   :  { %865 = vst [vmem:[#allocation2 + $0x60] sm:$0xff] %v1084_v12  ;;  %v510_v15 = vpack.c.bf16 %v478_v11, %v476_v10 }
 0x191   :  { %1085 = vtanh.f32 %v774_v13  ;;  %726 = vmatmul.bf16.gmra.mxu2 %v509_v14 }
 0x192   :  { %815 = vmatmul.bf16.gmra.mxu3 %v510_v15 }
 0x194   :  { %v687_v5 = vpop.f32.mrf.mxu2 }
 0x195   :  { %v688_v7 = vadd.f32 %v1452_v3, %v687_v5  ;;  %v776_v16 = vpop.f32.mrf.mxu3 }
 0x197   :  { %v1086_v17 = vpop.eup %1085  ;;  %v777_v18 = vadd.f32 %v776_v16, %v688_v7 }
 0x198   :  { %866 = vst [vmem:[#allocation2 + $0x68] sm:$0xff] %v1086_v17 }
 0x199   :  { %1087 = vtanh.f32 %v777_v18 }
 0x19c   :  { %v689_v19 = vpop.f32.mrf.mxu2 }
 0x19d   :  { %v690_v20 = vadd.f32 %v1452_v3, %v689_v19  ;;  %v778_v21 = vpop.f32.mrf.mxu3 }
 0x19f   :  { %v1088_v22 = vpop.eup %1087  ;;  %v779_v23 = vadd.f32 %v778_v21, %v690_v20 }
 0x1a0   :  { %867 = vst [vmem:[#allocation2 + $0x70] sm:$0xff] %v1088_v22 }
 0x1a1   :  { %1089 = vtanh.f32 %v779_v23 }
 0x1a4   :  { %v692_v24 = vpop.f32.mrf.mxu2 }
 0x1a5   :  { %v693_v25 = vadd.f32 %v1452_v3, %v692_v24  ;;  %v781_v26 = vpop.f32.mrf.mxu3 }
 0x1a7   :  { %v1090_v27 = vpop.eup %1089  ;;  %v782_v28 = vadd.f32 %v781_v26, %v693_v25 }
 0x1a8   :  { %868 = vst [vmem:[#allocation2 + $0x78] sm:$0xff] %v1090_v27 }
 0x1a9   :  { %1091 = vtanh.f32 %v782_v28 }
 0x1ac   :  { %v694_v29 = vpop.f32.mrf.mxu2 }
 0x1ad   :  { %v695_v30 = vadd.f32 %v1452_v3, %v694_v29  ;;  %v783_v31 = vpop.f32.mrf.mxu3 }
 0x1af   :  { %v1092_v32 = vpop.eup %1091  ;;  %v784_v33 = vadd.f32 %v783_v31, %v695_v30 }
 0x1b0   :  { %869 = vst [vmem:[#allocation2 + $0x80] sm:$0xff] %v1092_v32 }
 0x1b1   :  { %1093 = vtanh.f32 %v784_v33 }
 0x1b4   :  { %v697_v34 = vpop.f32.mrf.mxu2 }
 0x1b5   :  { %v698_v35 = vadd.f32 %v1452_v3, %v697_v34  ;;  %v786_v36 = vpop.f32.mrf.mxu3 }
 0x1b7   :  { %v1094_v37 = vpop.eup %1093  ;;  %v787_v38 = vadd.f32 %v786_v36, %v698_v35 }
 0x1b8   :  { %870 = vst [vmem:[#allocation2 + $0x88] sm:$0xff] %v1094_v37 }
 0x1b9   :  { %1095 = vtanh.f32 %v787_v38 }
 0x1bc   :  { %v699_v39 = vpop.f32.mrf.mxu2 }
 0x1bd   :  { %v700_v40 = vadd.f32 %v1452_v3, %v699_v39  ;;  %v788_v41 = vpop.f32.mrf.mxu3 }
 0x1bf   :  { %v1096_v42 = vpop.eup %1095  ;;  %v789_v43 = vadd.f32 %v788_v41, %v700_v40 }
 0x1c0   :  { %871 = vst [vmem:[#allocation2 + $0x90] sm:$0xff] %v1096_v42 }
 0x1c1   :  { %1097 = vtanh.f32 %v789_v43 }
 0x1c4   :  { %v702_v44 = vpop.f32.mrf.mxu2 }
 0x1c5   :  { %v703_v45 = vadd.f32 %v1452_v3, %v702_v44  ;;  %v791_v46 = vpop.f32.mrf.mxu3 }
 0x1c7   :  { %v1098_v47 = vpop.eup %1097  ;;  %v792_v48 = vadd.f32 %v791_v46, %v703_v45 }
 0x1c8   :  { %872 = vst [vmem:[#allocation2 + $0x98] sm:$0xff] %v1098_v47 }
 0x1c9   :  { %1099 = vtanh.f32 %v792_v48 }
 0x1cc   :  { %v704_v49 = vpop.f32.mrf.mxu2 }
 0x1cd   :  { %v705_v50 = vadd.f32 %v1452_v3, %v704_v49  ;;  %v793_v51 = vpop.f32.mrf.mxu3 }
 0x1cf   :  { %v1100_v52 = vpop.eup %1099  ;;  %v794_v53 = vadd.f32 %v793_v51, %v705_v50 }
 0x1d0   :  { %873 = vst [vmem:[#allocation2 + $0xa0] sm:$0xff] %v1100_v52 }
 0x1d1   :  { %1101 = vtanh.f32 %v794_v53 }
 0x1d4   :  { %v707_v54 = vpop.f32.mrf.mxu2 }
 0x1d5   :  { %v708_v55 = vadd.f32 %v1452_v3, %v707_v54  ;;  %v796_v56 = vpop.f32.mrf.mxu3 }
 0x1d7   :  { %v1102_v57 = vpop.eup %1101  ;;  %v797_v58 = vadd.f32 %v796_v56, %v708_v55 }
 0x1d8   :  { %874 = vst [vmem:[#allocation2 + $0xa8] sm:$0xff] %v1102_v57 }
 0x1d9   :  { %1103 = vtanh.f32 %v797_v58 }
 0x1dc   :  { %v709_v59 = vpop.f32.mrf.mxu2 }
 0x1dd   :  { %v710_v60 = vadd.f32 %v1452_v3, %v709_v59  ;;  %v798_v61 = vpop.f32.mrf.mxu3 }
 0x1df   :  { %v1104_v62 = vpop.eup %1103  ;;  %v799_v63 = vadd.f32 %v798_v61, %v710_v60 }
 0x1e0   :  { %875 = vst [vmem:[#allocation2 + $0xb0] sm:$0xff] %v1104_v62 }
 0x1e1   :  { %1105 = vtanh.f32 %v799_v63 }
 0x1e4   :  { %v712_v0 = vpop.f32.mrf.mxu2 }
 0x1e5   :  { %v713_v1 = vadd.f32 %v1452_v3, %v712_v0  ;;  %v801_v2 = vpop.f32.mrf.mxu3 }
 0x1e7   :  { %v1106_v4 = vpop.eup %1105  ;;  %v802_v6 = vadd.f32 %v801_v2, %v713_v1 }
 0x1e8   :  { %876 = vst [vmem:[#allocation2 + $0xb8] sm:$0xff] %v1106_v4 }
 0x1e9   :  { %1107 = vtanh.f32 %v802_v6 }
 0x1ec   :  { %v714_v8 = vpop.f32.mrf.mxu2 }
 0x1ed   :  { %v715_v9 = vadd.f32 %v1452_v3, %v714_v8  ;;  %v803_v10 = vpop.f32.mrf.mxu3 }
 0x1ef   :  { %v1108_v11 = vpop.eup %1107  ;;  %v804_v12 = vadd.f32 %v803_v10, %v715_v9 }
 0x1f0   :  { %877 = vst [vmem:[#allocation2 + $0xc0] sm:$0xff] %v1108_v11 }
 0x1f1   :  { %1109 = vtanh.f32 %v804_v12 }
 0x1f4   :  { %v717_v13 = vpop.f32.mrf.mxu2 }
 0x1f5   :  { %v718_v14 = vadd.f32 %v1452_v3, %v717_v13  ;;  %v806_v15 = vpop.f32.mrf.mxu3 }
 0x1f7   :  { %v1110_v5 = vpop.eup %1109  ;;  %v807_v7 = vadd.f32 %v806_v15, %v718_v14 }
 0x1f8   :  { %878 = vst [vmem:[#allocation2 + $0xc8] sm:$0xff] %v1110_v5 }
 0x1f9   :  { %1111 = vtanh.f32 %v807_v7 }
 0x1fc   :  { %v719_v16 = vpop.f32.mrf.mxu2 }
 0x1fd   :  { %v720_v17 = vadd.f32 %v1452_v3, %v719_v16  ;;  %v808_v18 = vpop.f32.mrf.mxu3 }
 0x1ff   :  { %v1112_v19 = vpop.eup %1111  ;;  %v809_v20 = vadd.f32 %v808_v18, %v720_v17 }
 0x200   :  { %879 = vst [vmem:[#allocation2 + $0xd0] sm:$0xff] %v1112_v19 }
 0x201   :  { %1113 = vtanh.f32 %v809_v20 }
 0x204   :  { %v722_v21 = vpop.f32.mrf.mxu2 }
 0x205   :  { %v723_v22 = vadd.f32 %v1452_v3, %v722_v21  ;;  %v811_v23 = vpop.f32.mrf.mxu3 }
 0x207   :  { %v1114_v24 = vpop.eup %1113  ;;  %v812_v25 = vadd.f32 %v811_v23, %v723_v22 }
 0x208   :  { %880 = vst [vmem:[#allocation2 + $0xd8] sm:$0xff] %v1114_v24 }
 0x209   :  { %1115 = vtanh.f32 %v812_v25 }
 0x20c   :  { %v724_v26 = vpop.f32.mrf.mxu2 }
 0x20d   :  { %v725_v27 = vadd.f32 %v1452_v3, %v724_v26  ;;  %v813_v28 = vpop.f32.mrf.mxu3 }
 0x20f   :  { %v1116_v29 = vpop.eup %1115  ;;  %v814_v30 = vadd.f32 %v813_v28, %v725_v27 }
 0x210   :  { %881 = vst [vmem:[#allocation2 + $0xe0] sm:$0xff] %v1116_v29 }
 0x211   :  { %1117 = vtanh.f32 %v814_v30 }
 0x214   :  { %v727_v31 = vpop.f32.mrf.mxu2 }
 0x215   :  { %v728_v32 = vadd.f32 %v1452_v3, %v727_v31  ;;  %v816_v33 = vpop.f32.mrf.mxu3 }
 0x217   :  { %v1118_v34 = vpop.eup %1117  ;;  %v817_v35 = vadd.f32 %v816_v33, %v728_v32 }
 0x218   :  { %882 = vst [vmem:[#allocation2 + $0xe8] sm:$0xff] %v1118_v34 }
 0x219   :  { %1119 = vtanh.f32 %v817_v35 }
 0x21c   :  { %v729_v36 = vpop.f32.mrf.mxu2 }
 0x21d   :  { %v730_v37 = vadd.f32 %v1452_v3, %v729_v36  ;;  %v818_v38 = vpop.f32.mrf.mxu3 }
 0x21f   :  { %v1120_v39 = vpop.eup %1119  ;;  %v819_v40 = vadd.f32 %v818_v38, %v730_v37 }
 0x220   :  { %883 = vst [vmem:[#allocation2 + $0xf0] sm:$0xff] %v1120_v39 }
 0x221   :  { %1121 = vtanh.f32 %v819_v40 }
 0x227   :  { %v1122_v41 = vpop.eup %1121 }
 0x228   :  { %884 = vst [vmem:[#allocation2 + $0xf8] sm:$0xff] %v1122_v41 }
 0x229   :  { %897 = dma.vmem_to_hbm [thread:$0]  %s890_s3, 4096, %s892_s19, [#allocation3], %s1150_s20, %s1150_s20, %s1151_s21  }
 0x22a   :  { %1147 = dma.done.wait [#allocation3], 4096  }
 0x22b   :  { %1148 = vsyncadd [#allocation3], 4294963200 }
 0x22c   :  { %902 = vsyncpa [#allocation3], 1 }

</bundles_post_ra>
